<compile_context>
chip_gen: v6e
topology: v6e:2x2x1
jax: 0.10.0
libtpu: 0.0.40
codegen_flags: <defaults>
</compile_context>

<pallas_src>
import jax
import jax.numpy as jnp
from jax.experimental import pallas as pl
from jax.experimental.pallas import tpu as pltpu


def _make_fusion_kernel(num_views):
    inv_v = 1.0 / float(num_views)

    def kernel(*refs):
        corr_refs = refs[:num_views]                # each (1, TC, S)
        mask_refs = refs[num_views:2 * num_views]   # each (1, 1, S)
        fused_corr_ref = refs[2 * num_views]        # (1, TC, S)
        fused_mask_ref = refs[2 * num_views + 1]    # (1, 1, S)
        mask_mean_ref = refs[2 * num_views + 2]     # VMEM scratch (1, 1, S) f32

        # Mask mean: compute once per batch item (first channel step only),
        # keep the f32 result resident in scratch, write the output once.
        @pl.when(pl.program_id(1) == 0)
        def _():
            m = mask_refs[0][...].astype(jnp.float32)
            for r in mask_refs[1:]:
                m = m + r[...].astype(jnp.float32)
            m = m * inv_v
            mask_mean_ref[...] = m
            fused_mask_ref[...] = m.astype(fused_mask_ref.dtype)

        # Corr mean (f32 accumulate) * mask mean, broadcast over channels.
        acc = corr_refs[0][...].astype(jnp.float32)
        for r in corr_refs[1:]:
            acc = acc + r[...].astype(jnp.float32)
        fused_corr_ref[...] = (
            (acc * inv_v) * mask_mean_ref[...]
        ).astype(fused_corr_ref.dtype)

    return kernel


def _pick_channel_tile(C, S, V, itemsize):
    """Largest channel tile whose double-buffered footprint stays well under
    the smallest scoped-VMEM default across generations (v5e: 16 MiB)."""
    budget = 8 * 1024 * 1024  # bytes, conservative on v5e/v6e/v7x
    # per grid step (double buffered): (V corr + 1 corr out) tiles of TC rows
    # plus (V mask + 1 mask out + scratch) tiles of 1 row, all of width S.
    denom = 2 * itemsize * S * (V + 1)
    tc = max(1, budget // denom - 1)
    if tc >= C:
        return C
    # Partial-C tiles must respect sublane tiling on the second-to-last dim.
    align = 8 if itemsize >= 4 else (16 if itemsize == 2 else 32)
    return max(align, (tc // align) * align)


def _average_fusion_pallas(corrs, masks):
    """corrs: list of V arrays [N, C, D, H, W]; masks: list of V arrays [N, 1, D, H, W]."""
    V = len(corrs)
    N, C, D, H, W = corrs[0].shape
    S = D * H * W
    corr_dtype = corrs[0].dtype
    mask_dtype = masks[0].dtype
    itemsize = jnp.dtype(corr_dtype).itemsize

    # Free (contiguous) reshapes: flatten spatial dims into one lane-dense axis.
    corrs2 = [c.reshape(N, C, S) for c in corrs]
    masks2 = [m.reshape(N, 1, S) for m in masks]

    TC = _pick_channel_tile(C, S, V, itemsize)
    num_c_blocks = pl.cdiv(C, TC)

    corr_spec = pl.BlockSpec((1, TC, S), lambda n, c: (n, c, 0))
    mask_spec = pl.BlockSpec((1, 1, S), lambda n, c: (n, 0, 0))

    in_specs = [corr_spec] * V + [mask_spec] * V
    out_specs = [
        pl.BlockSpec((1, TC, S), lambda n, c: (n, c, 0)),   # fused_corr
        pl.BlockSpec((1, 1, S), lambda n, c: (n, 0, 0)),    # fused_mask
    ]

    corr_elems = N * C * S
    mask_elems = N * S
    cost = pl.CostEstimate(
        flops=V * corr_elems + V * mask_elems + 2 * corr_elems + mask_elems,
        transcendentals=0,
        bytes_accessed=itemsize * (V * corr_elems + V * mask_elems
                                   + corr_elems + mask_elems),
    )

    fused_corr, fused_mask = pl.pallas_call(
        _make_fusion_kernel(V),
        out_shape=(
            jax.ShapeDtypeStruct((N, C, S), corr_dtype),
            jax.ShapeDtypeStruct((N, 1, S), mask_dtype),
        ),
        grid_spec=pltpu.PrefetchScalarGridSpec(
            num_scalar_prefetch=0,
            grid=(N, num_c_blocks),
            in_specs=in_specs,
            out_specs=out_specs,
            scratch_shapes=[pltpu.VMEM((1, 1, S), jnp.float32)],
        ),
        compiler_params=pltpu.CompilerParams(
            # fused_mask output block is constant along the channel axis, so
            # that axis must stay "arbitrary"; batch axis shards across cores.
            dimension_semantics=("parallel", "arbitrary"),
        ),
        cost_estimate=cost,
    )(*corrs2, *masks2)

    return (fused_corr.reshape(N, C, D, H, W),
            fused_mask.reshape(N, 1, D, H, W))


def average_fusion_3d(corrs, masks):
    """Mirrors AverageFusion3D.forward: corrs/masks are lists of arrays."""
    if len(corrs) > 1:
        return _average_fusion_pallas(corrs, masks)
    else:
        # Single-view path in the PyTorch module is a pure pass-through
        # (no mask multiply), so no kernel is needed.
        return corrs[0], masks[0]


if __name__ == "__main__":
    key = jax.random.PRNGKey(0)
    V, N, C, D, H, W = 3, 2, 4, 8, 16, 16

    k1, k2 = jax.random.split(key)
    corrs = [jax.random.normal(jax.random.fold_in(k1, i), (N, C, D, H, W),
                               dtype=jnp.float32) for i in range(V)]
    masks = [jax.nn.sigmoid(
                 jax.random.normal(jax.random.fold_in(k2, i), (N, 1, D, H, W),
                                   dtype=jnp.float32)) for i in range(V)]

    fused_corr, fused_mask = average_fusion_3d(corrs, masks)
    jax.block_until_ready((fused_corr, fused_mask))

    # Reference (plain JAX) check of the PyTorch semantics.
    ref_mask = jnp.stack(masks, axis=0).mean(0)
    ref_corr = jnp.stack(corrs, axis=0).mean(0) * ref_mask
    assert fused_corr.shape == (N, C, D, H, W)
    assert fused_mask.shape == (N, 1, D, H, W)
    assert jnp.allclose(fused_corr, ref_corr, atol=1e-5, rtol=1e-5)
    assert jnp.allclose(fused_mask, ref_mask, atol=1e-5, rtol=1e-5)

    # Single-view path check (pass-through, matching the PyTorch module).
    c1, m1 = average_fusion_3d(corrs[:1], masks[:1])
    assert jnp.array_equal(c1, corrs[0]) and jnp.array_equal(m1, masks[0])

    print("KERNEL_OK")
</pallas_src>

<mosaic_0001>
module attributes {stable_mosaic.version = 11 : i64} {
  func.func @kernel(%arg0: i32, %arg1: i32, %arg2: memref<1x4x2048xf32, #tpu.memory_space<vmem>>, %arg3: memref<1x4x2048xf32, #tpu.memory_space<vmem>>, %arg4: memref<1x4x2048xf32, #tpu.memory_space<vmem>>, %arg5: memref<1x1x2048xf32, #tpu.memory_space<vmem>>, %arg6: memref<1x1x2048xf32, #tpu.memory_space<vmem>>, %arg7: memref<1x1x2048xf32, #tpu.memory_space<vmem>>, %arg8: memref<1x4x2048xf32, #tpu.memory_space<vmem>>, %arg9: memref<1x1x2048xf32, #tpu.memory_space<vmem>>, %arg10: memref<1x1x2048xf32, #tpu.memory_space<vmem>>) attributes {dimension_semantics = [#tpu.dimension_semantics<parallel>, #tpu.dimension_semantics<arbitrary>], iteration_bounds = array<i64: 2, 1>, scalar_prefetch = 0 : i64, scratch_operands = 1 : i64, tpu.core_type = #tpu.core_type<tc>, window_params = [{transform_indices = @transform_0, window_bounds = array<i64: 1, 4, 2048>}, {transform_indices = @transform_1, window_bounds = array<i64: 1, 4, 2048>}, {transform_indices = @transform_2, window_bounds = array<i64: 1, 4, 2048>}, {transform_indices = @transform_3, window_bounds = array<i64: 1, 1, 2048>}, {transform_indices = @transform_4, window_bounds = array<i64: 1, 1, 2048>}, {transform_indices = @transform_5, window_bounds = array<i64: 1, 1, 2048>}, {transform_indices = @transform_6, window_bounds = array<i64: 1, 4, 2048>}, {transform_indices = @transform_7, window_bounds = array<i64: 1, 1, 2048>}]} {
    %c0_i32 = arith.constant 0 : i32
    %0 = arith.cmpi eq, %arg1, %c0_i32 : i32
    %1 = arith.extui %0 : i1 to i32
    %c0_i32_0 = arith.constant 0 : i32
    %2 = arith.cmpi ne, %1, %c0_i32_0 : i32
    scf.if %2 {
      %c0_15 = arith.constant 0 : index
      %c0_16 = arith.constant 0 : index
      %c0_17 = arith.constant 0 : index
      %14 = vector.load %arg5[%c0_15, %c0_16, %c0_17] : memref<1x1x2048xf32, #tpu.memory_space<vmem>>, vector<1x1x2048xf32>
      %c0_18 = arith.constant 0 : index
      %c0_19 = arith.constant 0 : index
      %c0_20 = arith.constant 0 : index
      %15 = vector.load %arg6[%c0_18, %c0_19, %c0_20] : memref<1x1x2048xf32, #tpu.memory_space<vmem>>, vector<1x1x2048xf32>
      %16 = arith.addf %14, %15 : vector<1x1x2048xf32>
      %c0_21 = arith.constant 0 : index
      %c0_22 = arith.constant 0 : index
      %c0_23 = arith.constant 0 : index
      %17 = vector.load %arg7[%c0_21, %c0_22, %c0_23] : memref<1x1x2048xf32, #tpu.memory_space<vmem>>, vector<1x1x2048xf32>
      %18 = arith.addf %16, %17 : vector<1x1x2048xf32>
      %cst_24 = arith.constant 0.333333343 : f32
      %19 = vector.broadcast %cst_24 : f32 to vector<1x1x2048xf32>
      %20 = arith.mulf %18, %19 : vector<1x1x2048xf32>
      %c0_25 = arith.constant 0 : index
      %c0_26 = arith.constant 0 : index
      %c0_27 = arith.constant 0 : index
      %21 = vector.load %arg10[%c0_25, %c0_26, %c0_27] : memref<1x1x2048xf32, #tpu.memory_space<vmem>>, vector<1x1x2048xf32>
      tpu.vector_store %arg10[%c0_25, %c0_26, %c0_27], %20 {strides = array<i32>} : memref<1x1x2048xf32, #tpu.memory_space<vmem>>, vector<1x1x2048xf32>,
      %c0_28 = arith.constant 0 : index
      %c0_29 = arith.constant 0 : index
      %c0_30 = arith.constant 0 : index
      %22 = vector.load %arg9[%c0_28, %c0_29, %c0_30] : memref<1x1x2048xf32, #tpu.memory_space<vmem>>, vector<1x1x2048xf32>
      tpu.vector_store %arg9[%c0_28, %c0_29, %c0_30], %20 {strides = array<i32>} : memref<1x1x2048xf32, #tpu.memory_space<vmem>>, vector<1x1x2048xf32>,
    } else {
    }
    %c0 = arith.constant 0 : index
    %c0_1 = arith.constant 0 : index
    %c0_2 = arith.constant 0 : index
    %3 = vector.load %arg2[%c0, %c0_1, %c0_2] : memref<1x4x2048xf32, #tpu.memory_space<vmem>>, vector<1x4x2048xf32>
    %c0_3 = arith.constant 0 : index
    %c0_4 = arith.constant 0 : index
    %c0_5 = arith.constant 0 : index
    %4 = vector.load %arg3[%c0_3, %c0_4, %c0_5] : memref<1x4x2048xf32, #tpu.memory_space<vmem>>, vector<1x4x2048xf32>
    %5 = arith.addf %3, %4 : vector<1x4x2048xf32>
    %c0_6 = arith.constant 0 : index
    %c0_7 = arith.constant 0 : index
    %c0_8 = arith.constant 0 : index
    %6 = vector.load %arg4[%c0_6, %c0_7, %c0_8] : memref<1x4x2048xf32, #tpu.memory_space<vmem>>, vector<1x4x2048xf32>
    %7 = arith.addf %5, %6 : vector<1x4x2048xf32>
    %cst = arith.constant 0.333333343 : f32
    %8 = vector.broadcast %cst : f32 to vector<1x4x2048xf32>
    %9 = arith.mulf %7, %8 : vector<1x4x2048xf32>
    %c0_9 = arith.constant 0 : index
    %c0_10 = arith.constant 0 : index
    %c0_11 = arith.constant 0 : index
    %10 = vector.load %arg10[%c0_9, %c0_10, %c0_11] : memref<1x1x2048xf32, #tpu.memory_space<vmem>>, vector<1x1x2048xf32>
    %11 = vector.broadcast %10 : vector<1x1x2048xf32> to vector<1x4x2048xf32>
    %12 = arith.mulf %9, %11 : vector<1x4x2048xf32>
    %c0_12 = arith.constant 0 : index
    %c0_13 = arith.constant 0 : index
    %c0_14 = arith.constant 0 : index
    %13 = vector.load %arg8[%c0_12, %c0_13, %c0_14] : memref<1x4x2048xf32, #tpu.memory_space<vmem>>, vector<1x4x2048xf32>
    tpu.vector_store %arg8[%c0_12, %c0_13, %c0_14], %12 {strides = array<i32>} : memref<1x4x2048xf32, #tpu.memory_space<vmem>>, vector<1x4x2048xf32>,
    return
  }
  func.func @transform_0(%arg0: i32, %arg1: i32) -> (i32, i32, i32) {
    %c0_i32 = arith.constant 0 : i32
    %c0_i32_0 = arith.constant 0 : i32
    return %arg0, %arg1, %c0_i32 : i32, i32, i32
  }
  func.func @transform_1(%arg0: i32, %arg1: i32) -> (i32, i32, i32) {
    %c0_i32 = arith.constant 0 : i32
    %c0_i32_0 = arith.constant 0 : i32
    return %arg0, %arg1, %c0_i32 : i32, i32, i32
  }
  func.func @transform_2(%arg0: i32, %arg1: i32) -> (i32, i32, i32) {
    %c0_i32 = arith.constant 0 : i32
    %c0_i32_0 = arith.constant 0 : i32
    return %arg0, %arg1, %c0_i32 : i32, i32, i32
  }
  func.func @transform_3(%arg0: i32, %arg1: i32) -> (i32, i32, i32) {
    %c0_i32 = arith.constant 0 : i32
    %c0_i32_0 = arith.constant 0 : i32
    %c0_i32_1 = arith.constant 0 : i32
    return %arg0, %c0_i32, %c0_i32_0 : i32, i32, i32
  }
  func.func @transform_4(%arg0: i32, %arg1: i32) -> (i32, i32, i32) {
    %c0_i32 = arith.constant 0 : i32
    %c0_i32_0 = arith.constant 0 : i32
    %c0_i32_1 = arith.constant 0 : i32
    return %arg0, %c0_i32, %c0_i32_0 : i32, i32, i32
  }
  func.func @transform_5(%arg0: i32, %arg1: i32) -> (i32, i32, i32) {
    %c0_i32 = arith.constant 0 : i32
    %c0_i32_0 = arith.constant 0 : i32
    %c0_i32_1 = arith.constant 0 : i32
    return %arg0, %c0_i32, %c0_i32_0 : i32, i32, i32
  }
  func.func @transform_6(%arg0: i32, %arg1: i32) -> (i32, i32, i32) {
    %c0_i32 = arith.constant 0 : i32
    %c0_i32_0 = arith.constant 0 : i32
    return %arg0, %arg1, %c0_i32 : i32, i32, i32
  }
  func.func @transform_7(%arg0: i32, %arg1: i32) -> (i32, i32, i32) {
    %c0_i32 = arith.constant 0 : i32
    %c0_i32_0 = arith.constant 0 : i32
    %c0_i32_1 = arith.constant 0 : i32
    return %arg0, %c0_i32, %c0_i32_0 : i32, i32, i32
  }
}

</mosaic_0001>

<bundles_post_ra>
// kernel: tpu_custom_call.1
= control target key start
LH: loop header
LB: loop body
LE: loop exit
PB: predicated region body
PF: predicated region fallthrough
CT: control target
= control target key end

     0   :  { %s1804_s0 = inlined_call_operand.hbm [shape: f32[2,4,2048], index: 0, kind: input, shape index: {}]   ;;  %s1805_s1 = inlined_call_operand.hbm [shape: f32[2,4,2048], index: 1, kind: input, shape index: {}]   ;;  %s1806_s2 = inlined_call_operand.hbm [shape: f32[2,4,2048], index: 2, kind: input, shape index: {}]   ;;  %s1807_s3 = inlined_call_operand.hbm [shape: f32[2,1,2048], index: 3, kind: input, shape index: {}]   ;;  %s1808_s4 = inlined_call_operand.hbm [shape: f32[2,1,2048], index: 4, kind: input, shape index: {}]   ;;  %s1809_s5 = inlined_call_operand.hbm [shape: f32[2,1,2048], index: 5, kind: input, shape index: {}]   ;;  %s1810_s6 = inlined_call_operand.hbm [shape: f32[2,4,2048], index: 6, kind: output, shape index: {0}]   ;;  %s1811_s7 = inlined_call_operand.hbm [shape: f32[2,1,2048], index: 7, kind: output, shape index: {1}]  }
   0x1   :  { %1823 = sst [smem:[#allocation31_spill]] %s1805_s1 }
   0x2   :  { %1824 = sst [smem:[#allocation32_spill]] %s1807_s3 }
   0x3   :  { %1825 = sst [smem:[#allocation33_spill]] %s1810_s6 }
   0x4   :  { %13 = vsyncpa [#allocation4], 0 }
   0x5   :  { %15 = vsyncpa [#allocation4 + $0x1], 0 }
   0x6   :  { %16 = vsyncpa [#allocation7], 0 }
   0x7   :  { %18 = vsyncpa [#allocation7 + $0x1], 0 }
   0x8   :  { %19 = vsyncpa [#allocation10], 0 }
   0x9   :  { %21 = vsyncpa [#allocation10 + $0x1], 0 }
   0xa   :  { %22 = vsyncpa [#allocation13], 0 }
   0xb   :  { %24 = vsyncpa [#allocation13 + $0x1], 0 }
   0xc   :  { %25 = vsyncpa [#allocation5], 0 }
   0xd   :  { %27 = vsyncpa [#allocation5 + $0x1], 0 }
   0xe   :  { %28 = vsyncpa [#allocation16], 0 }
   0xf   :  { %30 = vsyncpa [#allocation16 + $0x1], 0  ;;  %s1430_s24 = smov 0   ;;  %s1432_s25 = smov 0  }
  0x10   :  { %s1434_s26 = smov 0   ;;  %s1436_s27 = smov 0  }
  0x11   :  { %s1438_s28 = smov 0   ;;  %s1440_s29 = smov 0  }
  0x12 LB: > { %1826 = sst [smem:[#allocation23_spill]] %s1360_s24  ;;  %s1461_s30 = sadd.s32 4294967295, %s1380_s29   ;;  %s1380_s29 = sphi %s1440_s29, %s36_s29   ;;  %s1376_s28 = sphi %s1438_s28, %s1854_s28   ;;  %s1372_s27 = sphi %s1436_s27, %s1853_s27   ;;  %s1368_s26 = sphi %s1434_s26, %s1852_s26   ;;  %s1364_s25 = sphi %s1432_s25, %s1856_s25   ;;  %s1360_s24 = sphi %s1430_s24, %s1855_s24  }
  0x13   : > { %1827 = sst [smem:[#allocation24_spill]] %s1368_s26  ;;  %s952_s8 = sadd.s32 4294967294, %s1380_s29  }
  0x14   : > { %1828 = sst [smem:[#allocation25_spill]] %s1376_s28  ;;  %s48_s9 = sadd.s32 1, %s1376_s28 }
  0x15   : > { %1829 = sst [smem:[#allocation26_spill]] %s1380_s29  ;;  %s57_s10 = sadd.s32 1, %s1368_s26 }
  0x16   : > { %p50_p0 = scmp.ge.s32.totalorder %s48_s9, 2  ;;  %p64_p1 = scmp.ne.s32.totalorder %s1368_s26, %s1364_s25 }
  0x17   : > { %p65_p2 = scmp.eq.s32.totalorder %s1380_s29, 0  ;;  %p70_p3 = scmp.ne.s32.totalorder %s1364_s25, %s1360_s24 }
  0x18   : > { %s1858_s9 = smov (%p50_p0, %s48_s9), 0  ;;  %p71_p5 = scmp.eq.s32.totalorder %s1461_s30, 0 }
  0x19   : > { %1830 = sst [smem:[#allocation27_spill]] %s1858_s9  ;;  %p1473_p4 = por %p65_p2, %p64_p1 }
  0x1a   : > { %s52_s12 = ssub.s32 %s1376_s28, %s1858_s9  ;;  %p230_p6 = scmp.eq.s32.totalorder %s1461_s30, 1 }
  0x1b   : > { %p55_p7 = scmp.eq.s32.totalorder %s52_s12, 0  ;;  %p1481_p8 = por %p71_p5, %p70_p3 }
  0x1c   : > { %p1485_p9 = por %p230_p6, %p64_p1  ;;  %p236_p10 = scmp.eq.s32.totalorder %s952_s8, 1 }
  0x1d   : > { %s1490_s15 = scalar_select %p55_p7, %s1368_s26, %s57_s10  }
  0x1e   : > { %s1833_s14 = scalar_select %p1485_p9, 1, 0 }
  0x1f   : > { %1835 = sst [smem:[#allocation29_spill]] %s1490_s15  ;;  %p1492_p11 = por %p236_p10, %p70_p3 }
  0x20   : > { %1834 = sst [smem:[#allocation28_spill]] %s1833_s14  ;;  %p1040_p13 = scmp.lt.s32.totalorder %s1380_s29, 2 }
  0x21   : > { %s1836_s16 = scalar_select %p1492_p11, 1, 0 }
  0x22   : > { %s1499_s17 = sand.u32 1, %s1368_s26   ;;  %s1505_s19 = sshll.u32 %s1376_s28, 10 }
  0x23   : > { %1837 = sst [smem:[#allocation30_spill]] %s1836_s16  ;;  %s1502_s18 = sshll.u32 %s1499_s17, 6 }
  0x24   : > { %p1509_p0 = pnand %p1040_p13, %p1473_p4  ;;  %s1813_s21 = sand.u32 1, %s1380_s29  }
  0x25   : > { %s1839_s1 = sld [smem:[#allocation31_spill]]  ;;  %s307_s10 = scalar_lea.vmem [#allocation6], %s1502_s18 }
  0x26   : > { %s317_s12 = sshll.u32 %s307_s10, 4  ;;  %p973_p1 = scmp.ge.s32.totalorder %s1380_s29, 1  ;;  %s318_s12 = int_to_ptr.vmem [resolvable:$true] %s317_s12 }
  0x27   : > { %p400_p2 = scmp.lt.s32.totalorder %s1380_s29, 3  ;;  %s1523_s9 = scalar_lea.sflag [#allocation7], %s1813_s21 }
  0x28   : > { %p1527_p3 = pneg %p1509_p0  ;;  %s1103_s15 = scalar_lea.vmem %s318_s12, 1024 }
  0x29   : > { %p1104_p4 = scmp.ne.s32.totalorder %s318_s12, %s1103_s15  ;;  %s1382_s22 = smov [#allocation6]  }
  0x2a   : > { %s1108_s23 = sshll.u32 %s1382_s22, 4  ;;  %s1109_s23 = int_to_ptr.vmem [resolvable:$false] %s1108_s23 }
  0x2b   : > { %s315_s8 = scalar_lea.hbm %s1839_s1, %s1505_s19  ;;  %p1106_p5 = pnand %p1104_p4, %p1527_p3 }
  0x2c   : > { %s1110_s10 = scalar_lea.vmem %s1109_s23, 2048  ;;  %p1111_p7 = scmp.lt.s32.totalorder %s318_s12, %s1109_s23 }
  0x2d   : > { %p1107_p6 = pneg %p1106_p5  ;;  %p1112_p10 = scmp.lt.s32.totalorder %s1110_s10, %s1103_s15 }
  0x2f   : > { %p1113_p13 = por %p1112_p10, %p1111_p7 }
  0x31   : > { %p1114_p12 = pnand %p1113_p13, %p1107_p6 }
  0x33   : > { %1117 = shalt.err (!%p1114_p12)
}
  0x34   : > { %1020 = dma.hbm_to_vmem [thread:$0]  (!%p1509_p0), %s315_s8, 1024, %s318_s12, %s1523_s9  }
  0x35   : > { %p1540_p4 = pnand %p973_p1, %p400_p2  ;;  %s1545_s15 = sshll.u32 %s1499_s17, 4 }
  0x36   : > { %s1548_s23 = sshll.u32 %s1376_s28, 8  ;;  %s1842_s3 = sld [smem:[#allocation32_spill]] }
  0x37   : > { %s349_s26 = scalar_lea.vmem [#allocation9], %s1545_s15  ;;  %s1843_s8 = sand.u32 1, %s1380_s29  }
  0x38   : > { %s357_s16 = sshll.u32 %s349_s26, 4  ;;  %s1557_s12 = scalar_lea.sflag [#allocation10], %s1843_s8  ;;  %s358_s16 = int_to_ptr.vmem [resolvable:$true] %s357_s16 }
  0x39   : > { %s1131_s24 = scalar_lea.vmem %s358_s16, 256  ;;  %s1383_s6 = smov [#allocation9]  }
  0x3a   : > { %p1132_p12 = scmp.ne.s32.totalorder %s358_s16, %s1131_s24  ;;  %s1136_s14 = sshll.u32 %s1383_s6, 4  ;;  %s1137_s14 = int_to_ptr.vmem [resolvable:$false] %s1136_s14 }
  0x3b   : > { %s1138_s28 = scalar_lea.vmem %s1137_s14, 512  ;;  %p1139_p5 = scmp.lt.s32.totalorder %s358_s16, %s1137_s14 }
  0x3c   : > { %s355_s1 = scalar_lea.hbm %s1842_s3, %s1548_s23  ;;  %p1134_p1 = pnand %p1132_p12, %p1527_p3 }
  0x3d   : > { %p1140_p6 = scmp.lt.s32.totalorder %s1138_s28, %s1131_s24 }
  0x3e   : > { %p1135_p2 = pneg %p1134_p1 }
  0x3f   : > { %p1141_p7 = por %p1140_p6, %p1139_p5 }
  0x41   : > { %p1142_p10 = pnand %p1141_p7, %p1135_p2 }
  0x43   : > { %1145 = shalt.err (!%p1142_p10)
}
  0x44   : > { %1026 = dma.hbm_to_vmem [thread:$0]  (!%p1509_p0), %s355_s1, 256, %s358_s16, %s1557_s12  }
  0x45   : > { %s294_s10 = scalar_lea.hbm %s1804_s0, %s1505_s19  ;;  %s286_s6 = scalar_lea.vmem [#allocation3], %s1502_s18 }
  0x46   : > { %s296_s8 = sshll.u32 %s286_s6, 4  ;;  %s283_s14 = scalar_lea.sflag [#allocation4], %s1499_s17  ;;  %s297_s8 = int_to_ptr.vmem [resolvable:$true] %s296_s8 }
  0x47   : > { %s1159_s24 = scalar_lea.vmem %s297_s8, 1024  ;;  %s1384_s28 = smov [#allocation3]  }
  0x48   : > { %p1160_p13 = scmp.ne.s32.totalorder %s297_s8, %s1159_s24  ;;  %s1164_s3 = sshll.u32 %s1384_s28, 4  ;;  %s1165_s3 = int_to_ptr.vmem [resolvable:$false] %s1164_s3 }
  0x49   : > { %s1166_s29 = scalar_lea.vmem %s1165_s3, 2048  ;;  %p1167_p2 = scmp.lt.s32.totalorder %s297_s8, %s1165_s3 }
  0x4a   : > { %p1162_p12 = pnand %p1160_p13, %p1527_p3  ;;  %p1168_p5 = scmp.lt.s32.totalorder %s1166_s29, %s1159_s24 }
  0x4c   : > { %p1163_p1 = pneg %p1162_p12  ;;  %p1169_p6 = por %p1168_p5, %p1167_p2 }
  0x4e   : > { %p1170_p7 = pnand %p1169_p6, %p1163_p1 }
  0x50   : > { %1173 = shalt.err (!%p1170_p7)
}
  0x51   : > { %1017 = dma.hbm_to_vmem [thread:$0]  (!%p1509_p0), %s294_s10, 1024, %s297_s8, %s283_s14  }
  0x52   : > { %s336_s26 = scalar_lea.hbm %s1806_s2, %s1505_s19  ;;  %s328_s21 = scalar_lea.vmem [#allocation8], %s1502_s18 }
  0x53   : > { %s338_s6 = sshll.u32 %s328_s21, 4  ;;  %s1385_s3 = smov [#allocation8]   ;;  %s339_s6 = int_to_ptr.vmem [resolvable:$true] %s338_s6 }
  0x54   : > { %s1187_s28 = scalar_lea.vmem %s339_s6, 1024  ;;  %s1192_s29 = sshll.u32 %s1385_s3, 4  ;;  %s1193_s29 = int_to_ptr.vmem [resolvable:$false] %s1192_s29 }
  0x55   : > { %p1188_p10 = scmp.ne.s32.totalorder %s339_s6, %s1187_s28  ;;  %s1194_s24 = scalar_lea.vmem %s1193_s29, 2048 }
  0x56   : > { %p1195_p1 = scmp.lt.s32.totalorder %s339_s6, %s1193_s29  ;;  %p1196_p2 = scmp.lt.s32.totalorder %s1194_s24, %s1187_s28 }
  0x57   : > { %p1190_p13 = pnand %p1188_p10, %p1527_p3 }
  0x58   : > { %p1197_p5 = por %p1196_p2, %p1195_p1 }
  0x59   : > { %p1191_p12 = pneg %p1190_p13 }
  0x5b   : > { %p1198_p6 = pnand %p1197_p5, %p1191_p12 }
  0x5d   : > { %1201 = shalt.err (!%p1198_p6)
}
  0x5e   : > { %1023 = dma.hbm_to_vmem [thread:$0]  (!%p1509_p0), %s336_s26, 1024, %s339_s6, %s1523_s9  }
  0x5f   : > { %s374_s10 = scalar_lea.hbm %s1808_s4, %s1548_s23  ;;  %s368_s8 = scalar_lea.vmem [#allocation11], %s1545_s15 }
  0x60   : > { %s376_s14 = sshll.u32 %s368_s8, 4  ;;  %s1386_s16 = smov [#allocation11]   ;;  %s377_s14 = int_to_ptr.vmem [resolvable:$true] %s376_s14 }
  0x61   : > { %s1215_s1 = scalar_lea.vmem %s377_s14, 256  ;;  %s1220_s21 = sshll.u32 %s1386_s16, 4  ;;  %s1221_s21 = int_to_ptr.vmem [resolvable:$false] %s1220_s21 }
  0x62   : > { %p1216_p7 = scmp.ne.s32.totalorder %s377_s14, %s1215_s1  ;;  %s1222_s28 = scalar_lea.vmem %s1221_s21, 512 }
  0x63   : > { %p1223_p12 = scmp.lt.s32.totalorder %s377_s14, %s1221_s21  ;;  %p1224_p1 = scmp.lt.s32.totalorder %s1222_s28, %s1215_s1 }
  0x64   : > { %p1218_p10 = pnand %p1216_p7, %p1527_p3 }
  0x65   : > { %p1225_p2 = por %p1224_p1, %p1223_p12 }
  0x66   : > { %p1219_p13 = pneg %p1218_p10 }
  0x68   : > { %p1226_p5 = pnand %p1225_p2, %p1219_p13 }
  0x6a   : > { %1229 = shalt.err (!%p1226_p5)
}
  0x6b   : > { %1029 = dma.hbm_to_vmem [thread:$0]  (!%p1509_p0), %s374_s10, 256, %s377_s14, %s1557_s12  }
  0x6c   : > { %s393_s6 = scalar_lea.hbm %s1809_s5, %s1548_s23  ;;  %s387_s3 = scalar_lea.vmem [#allocation12], %s1545_s15 }
  0x6d   : > { %s395_s29 = sshll.u32 %s387_s3, 4  ;;  %s384_s24 = scalar_lea.sflag [#allocation13], %s1499_s17  ;;  %s396_s29 = int_to_ptr.vmem [resolvable:$true] %s395_s29 }
  0x6e   : > { %s1243_s18 = scalar_lea.vmem %s396_s29, 256  ;;  %s1387_s19 = smov [#allocation12]  }
  0x6f   : > { %p1244_p6 = scmp.ne.s32.totalorder %s396_s29, %s1243_s18  ;;  %s1248_s8 = sshll.u32 %s1387_s19, 4  ;;  %s1249_s8 = int_to_ptr.vmem [resolvable:$false] %s1248_s8 }
  0x70   : > { %s1250_s1 = scalar_lea.vmem %s1249_s8, 512  ;;  %p1251_p13 = scmp.lt.s32.totalorder %s396_s29, %s1249_s8 }
  0x71   : > { %p1246_p7 = pnand %p1244_p6, %p1527_p3  ;;  %p1252_p12 = scmp.lt.s32.totalorder %s1250_s1, %s1243_s18 }
  0x73   : > { %p1247_p10 = pneg %p1246_p7  ;;  %p1253_p1 = por %p1252_p12, %p1251_p13 }
  0x75   : > { %p1254_p2 = pnand %p1253_p1, %p1247_p10 }
  0x77   : > { %1257 = shalt.err (!%p1254_p2)
}
  0x78   : > { %1032 = dma.hbm_to_vmem [thread:$0]  (!%p1509_p0), %s393_s6, 256, %s396_s29, %s384_s24  }
  0x79   : > { %404 = sbr.rel (%p1540_p4) target bundleno = 188 (0xbc), region = 44  ;;  %s1607_s17 = sand.u32 (!%p1540_p4), 1, %s1364_s25  }
  0x7a   : > { %s1610_s11 = sshll.u32 (!%p1540_p4), %s1607_s17, 6  ;;  %s407_s15 = scalar_lea.sflag (!%p1540_p4), [#allocation4], %s1607_s17 }
  0x7b   : > { %s1614_s23 = scalar_lea.vmem (!%p1540_p4), [#allocation3], %s1610_s11 }
  0x7e   : > { %1335 = dma.done.wait (%p1481_p8), %s407_s15, 1024  }
  0x7f   : > { %1337 = vsyncadd (%p1481_p8), %s407_s15, 4294966272  ;;  %s415_s20 = sand.u32 1, %s1461_s30   ;;  %s1622_s12 = scalar_lea.vmem [#allocation6], %s1610_s11 }
  0x80   : > { %s416_s22 = scalar_lea.sflag [#allocation7], %s415_s20 }
  0x81   : > { %1339 = dma.done.wait (%p1481_p8), %s416_s22, 2048  }
  0x82   : > { %1341 = vsyncadd (%p1481_p8), %s416_s22, 4294965248  ;;  %s977_s10 = sshll.u32 %s1607_s17, 4  ;;  %s1630_s14 = scalar_lea.vmem [#allocation8], %s1610_s11 }
  0x83   : > { %s434_s16 = scalar_lea.sflag [#allocation10], %s415_s20  ;;  %s437_s21 = scalar_lea.vmem [#allocation9], %s977_s10 }
  0x84   : > { %1343 = dma.done.wait (%p1481_p8), %s434_s16, 512  }
  0x85   : > { %1345 = vsyncadd (%p1481_p8), %s434_s16, 4294966784  ;;  %s446_s30 = scalar_lea.vmem [#allocation11], %s977_s10  ;;  %s452_s28 = scalar_lea.sflag [#allocation13], %s1607_s17 }
  0x86   : > { %s455_s9 = scalar_lea.vmem [#allocation12], %s977_s10 }
  0x87   : > { %1347 = dma.done.wait (%p1481_p8), %s452_s28, 256  }
  0x88   : > { %1349 = vsyncadd (%p1481_p8), %s452_s28, 4294967040  ;;  %v588_v0 = vlaneseq  ;;  %v520_v2 = vld [vmem:[%s437_s21] sm:$0xff]  ;;  %v521_v6 = vld [vmem:[%s437_s21 + $0x8] sm:$0xff]  ;;  %s1643_s26 = scalar_lea.vmem [#allocation15], %s977_s10  ;;  %s997_s6 = sshll.u32 %s1372_s27, 8 }
  0x89   : > { %v522_v3 = vld [vmem:[%s446_s30] sm:$0xff]  ;;  %v523_v7 = vld [vmem:[%s446_s30 + $0x8] sm:$0xff]  ;;  %s720_s13 = sshll.u32 %s1643_s26, 4  ;;  %s1674_s24 = scalar_lea.hbm %s1811_s7, %s997_s6  ;;  %s1661_s13 = int_to_ptr.vmem [resolvable:$true] %s720_s13 }
  0x8a   : > { %v1641_v1 = vshrl.u32 %v588_v0, 7  ;;  %v526_v4 = vld [vmem:[%s455_s9] sm:$0xff]  ;;  %v524_v5 = vadd.f32 %v522_v3, %v520_v2  ;;  %v527_v8 = vld [vmem:[%s455_s9 + $0x8] sm:$0xff]  ;;  %v525_v9 = vadd.f32 %v523_v7, %v521_v6  ;;  %s690_s19 = scalar_lea.sflag [#allocation16], %s1607_s17  ;;  %s1258_s8 = scalar_lea.vmem %s1661_s13, 256 }
  0x8b   : > { %v536_v10 = vld [vmem:[%s1614_s23] sm:$0xff]  ;;  %v537_v17 = vld [vmem:[%s1614_s23 + $0x8] sm:$0xff]  ;;  %v538_v24 = vld [vmem:[%s1614_s23 + $0x10] sm:$0xff]  ;;  %p1259_p8 = scmp.ne.s32.totalorder %s1661_s13, %s1258_s8  ;;  %s1388_s1 = smov [#allocation15]  }
  0x8c   : > { %v544_v11 = vld [vmem:[%s1622_s12] sm:$0xff]  ;;  %v590_v13 = vsub.s32 0, %v1641_v1  ;;  %v594_v14 = vsub.s32 1, %v1641_v1  ;;  %v528_v15 = vadd.f32 %v526_v4, %v524_v5  ;;  %v545_v18 = vld [vmem:[%s1622_s12 + $0x8] sm:$0xff]  ;;  %v598_v20 = vsub.s32 2, %v1641_v1  ;;  %v546_v25 = vld [vmem:[%s1622_s12 + $0x10] sm:$0xff] }
  0x8d   : > { %v560_v12 = vld [vmem:[%s1630_s14] sm:$0xff]  ;;  %v552_v16 = vadd.f32 %v544_v11, %v536_v10  ;;  %v561_v19 = vld [vmem:[%s1630_s14 + $0x8] sm:$0xff]  ;;  %v602_v21 = vsub.s32 3, %v1641_v1  ;;  %v529_v22 = vadd.f32 %v527_v8, %v525_v9  ;;  %v553_v23 = vadd.f32 %v545_v18, %v537_v17  ;;  %v562_v31 = vld [vmem:[%s1630_s14 + $0x10] sm:$0xff]  ;;  %p1260_p0 = pnand %p1259_p8, %p1485_p9  ;;  %s1262_s15 = sshll.u32 %s1388_s1, 4  ;;  %s1263_s15 = int_to_ptr.vmem [resolvable:$false] %s1262_s15 }
  0x8e   : > { %v606_v26 = vsub.s32 4, %v1641_v1  ;;  %v610_v27 = vsub.s32 5, %v1641_v1  ;;  %v530_v28 = vmul.f32 0.33333334, %v528_v15  ;;  %v554_v30 = vadd.f32 %v546_v25, %v538_v24  ;;  %v539_v32 = vld [vmem:[%s1614_s23 + $0x18] sm:$0xff]  ;;  %v540_v44 = vld [vmem:[%s1614_s23 + $0x20] sm:$0xff]  ;;  %p1265_p4 = scmp.lt.s32.totalorder %s1661_s13, %s1263_s15 }
  0x8f   : > { %v568_v29 = vadd.f32 %v560_v12, %v552_v16  ;;  %v547_v33 = vld [vmem:[%s1622_s12 + $0x18] sm:$0xff]  ;;  %v614_v34 = vsub.s32 6, %v1641_v1  ;;  %v1667_v35 = vmul.f32 0.33333334, %v529_v22  ;;  %v569_v36 = vadd.f32 %v561_v19, %v553_v23  ;;  %v548_v45 = vld [vmem:[%s1622_s12 + $0x20] sm:$0xff]  ;;  %p1261_p3 = pneg %p1260_p0  ;;  %s1264_s20 = scalar_lea.vmem %s1263_s15, 512 }
  0x90   : > { %v555_v37 = vadd.f32 %v547_v33, %v539_v32  ;;  %v563_v38 = vld [vmem:[%s1630_s14 + $0x18] sm:$0xff]  ;;  %v618_v39 = vsub.s32 7, %v1641_v1  ;;  %534 = vst [vmem:[%s1643_s26] sm:$0xff] %v530_v28  ;;  %v591_v41 = vrot.slane %v530_v28, %v590_v13  ;;  %v595_v42 = vrot.slane %v530_v28, %v594_v14  ;;  %v564_v54 = vld [vmem:[%s1630_s14 + $0x20] sm:$0xff]  ;;  %p1266_p5 = scmp.lt.s32.totalorder %s1264_s20, %s1258_s8 }
  0x91   : > { %v576_v40 = vmul.f32 0.33333334, %v568_v29  ;;  %v599_v43 = vrot.slane %v530_v28, %v598_v20  ;;  %535 = vst [vmem:[%s1643_s26 + $0x8] sm:$0xff] %v1667_v35  ;;  %v577_v46 = vmul.f32 0.33333334, %v569_v36  ;;  %v603_v47 = vrot.slane %v530_v28, %v602_v21 }
  0x92   : > { %v570_v48 = vadd.f32 %v562_v31, %v554_v30  ;;  %v607_v49 = vrot.slane %v530_v28, %v606_v26  ;;  %v652_v50 = vcombine.low %v591_v41, %v595_v42  ;;  %v611_v51 = vrot.slane %v530_v28, %v610_v27  ;;  %p1267_p6 = por %p1266_p5, %p1265_p4 }
  0x93   : > { %v571_v52 = vadd.f32 %v563_v38, %v555_v37  ;;  %v615_v53 = vrot.slane %v530_v28, %v614_v34 }
  0x94   : > { %p1268_p7 = pnand %p1267_p6, %p1261_p3 }
  0x96   : > { %1271 = shalt.err (!%p1268_p7)
}
  0x97   : > { %s1272_s22 = scalar_lea.hbm %s1674_s24, 256  ;;  %s1276_s21 = scalar_lea.hbm %s1811_s7, 512 }
  0x98   : > { %p1273_p10 = scmp.ne.s32.totalorder %s1674_s24, %s1272_s22  ;;  %p1277_p1 = scmp.lt.s32.totalorder %s1674_s24, %s1811_s7 }
  0x99   : > { %p1278_p2 = scmp.lt.s32.totalorder %s1276_s21, %s1272_s22 }
  0x9a   : > { %p1274_p13 = pnand %p1273_p10, %p1485_p9 }
  0x9b   : > { %p1279_p8 = por %p1278_p2, %p1277_p1 }
  0x9c   : > { %p1275_p12 = pneg %p1274_p13 }
  0x9e   : > { %p1280_p0 = pnand %p1279_p8, %p1275_p12 }
  0xa0   : > { %1283 = shalt.err (!%p1280_p0)
}
  0xa1   : > { %1011 = dma.vmem_to_hbm [thread:$0]  (%p1485_p9), %s1661_s13, 256, %s1674_s24, %s690_s19   ;;  %v653_v55 = vcombine.low %v599_v43, %v603_v47  ;;  %v578_v56 = vmul.f32 0.33333334, %v570_v48  ;;  %v619_v57 = vrot.slane %v530_v28, %v618_v39  ;;  %v556_v58 = vadd.f32 %v548_v45, %v540_v44  ;;  %v541_v59 = vld [vmem:[%s1614_s23 + $0x28] sm:$0xff]  ;;  %v542_v2 = vld [vmem:[%s1614_s23 + $0x30] sm:$0xff]  ;;  %v551_v15 = vld [vmem:[%s1622_s12 + $0x38] sm:$0xff] }
  0xa2   : > { %v549_v60 = vld [vmem:[%s1622_s12 + $0x28] sm:$0xff]  ;;  %v668_v61 = vmul.f32 %v652_v50, %v576_v40  ;;  %v654_v62 = vcombine.low %v607_v49, %v611_v51  ;;  %v579_v63 = vmul.f32 0.33333334, %v571_v52  ;;  %v623_v0 = vrot.slane %v1667_v35, %v590_v13  ;;  %v550_v3 = vld [vmem:[%s1622_s12 + $0x30] sm:$0xff]  ;;  %s1731_s9 = scalar_lea.vmem [#allocation14], %s1610_s11  ;;  %v567_v24 = vld [vmem:[%s1630_s14 + $0x38] sm:$0xff] }
  0xa3   : > { %v669_v4 = vmul.f32 %v653_v55, %v577_v46  ;;  %v655_v5 = vcombine.low %v615_v53, %v619_v57  ;;  %v572_v6 = vadd.f32 %v564_v54, %v556_v58  ;;  %v627_v7 = vrot.slane %v1667_v35, %v594_v14  ;;  %v565_v8 = vld [vmem:[%s1630_s14 + $0x28] sm:$0xff]  ;;  %v566_v13 = vld [vmem:[%s1630_s14 + $0x30] sm:$0xff]  ;;  %v543_v14 = vld [vmem:[%s1614_s23 + $0x38] sm:$0xff]  ;;  %s996_s11 = sshll.u32 %s1372_s27, 10  ;;  %s706_s23 = sshll.u32 %s1731_s9, 4  ;;  %s707_s23 = int_to_ptr.vmem [resolvable:$true] %s706_s23 }
  0xa4   : > { %676 = vst [vmem:[%s1731_s9] sm:$0xff] %v668_v61  ;;  %v670_v9 = vmul.f32 %v654_v62, %v578_v56  ;;  %v557_v10 = vadd.f32 %v549_v60, %v541_v59  ;;  %v631_v11 = vrot.slane %v1667_v35, %v598_v20  ;;  %v635_v12 = vrot.slane %v1667_v35, %v602_v21  ;;  %s1845_s26 = sld [smem:[#allocation33_spill]]  ;;  %s685_s3 = scalar_lea.sflag [#allocation5], %s1607_s17 }
  0xa5   : > { %677 = vst [vmem:[%s1731_s9 + $0x8] sm:$0xff] %v669_v4  ;;  %v671_v16 = vmul.f32 %v655_v5, %v579_v63  ;;  %v580_v17 = vmul.f32 0.33333334, %v572_v6  ;;  %v656_v18 = vcombine.low %v623_v0, %v627_v7  ;;  %v558_v19 = vadd.f32 %v550_v3, %v542_v2  ;;  %s1284_s29 = scalar_lea.vmem %s707_s23, 1024  ;;  %s1389_s24 = smov [#allocation14]  }
  0xa6   : > { %678 = vst [vmem:[%s1731_s9 + $0x10] sm:$0xff] %v670_v9  ;;  %v573_v22 = vadd.f32 %v565_v8, %v557_v10  ;;  %v657_v23 = vcombine.low %v631_v11, %v635_v12  ;;  %v639_v20 = vrot.slane %v1667_v35, %v606_v26  ;;  %v643_v21 = vrot.slane %v1667_v35, %v610_v27  ;;  %p1285_p3 = scmp.ne.s32.totalorder %s707_s23, %s1284_s29  ;;  %s1288_s27 = sshll.u32 %s1389_s24, 4  ;;  %s1289_s27 = int_to_ptr.vmem [resolvable:$false] %s1288_s27 }
  0xa7   : > { %679 = vst [vmem:[%s1731_s9 + $0x18] sm:$0xff] %v671_v16  ;;  %v672_v25 = vmul.f32 %v656_v18, %v580_v17  ;;  %v574_v28 = vadd.f32 %v566_v13, %v558_v19  ;;  %v559_v29 = vadd.f32 %v551_v15, %v543_v14  ;;  %v647_v30 = vrot.slane %v1667_v35, %v614_v34  ;;  %s1290_s19 = scalar_lea.vmem %s1289_s27, 2048  ;;  %p1291_p6 = scmp.lt.s32.totalorder %s707_s23, %s1289_s27 }
  0xa8   : > { %v581_v31 = vmul.f32 0.33333334, %v573_v22  ;;  %v658_v32 = vcombine.low %v639_v20, %v643_v21  ;;  %v651_v26 = vrot.slane %v1667_v35, %v618_v39  ;;  %p1286_p4 = pnand %p1285_p3, %p1485_p9  ;;  %p1292_p7 = scmp.lt.s32.totalorder %s1290_s19, %s1284_s29 }
  0xa9   : > { %680 = vst [vmem:[%s1731_s9 + $0x20] sm:$0xff] %v672_v25  ;;  %v582_v27 = vmul.f32 0.33333334, %v574_v28  ;;  %v575_v33 = vadd.f32 %v567_v24, %v559_v29 }
  0xaa   : > { %v673_v36 = vmul.f32 %v657_v23, %v581_v31  ;;  %v659_v37 = vcombine.low %v647_v30, %v651_v26  ;;  %s1846_s13 = smov %s1845_s26  ;;  %s704_s6 = scalar_lea.hbm %s1845_s26, %s996_s11 }
  0xab   : > { %v674_v38 = vmul.f32 %v658_v32, %v582_v27  ;;  %v583_v40 = vmul.f32 0.33333334, %v575_v33  ;;  %p1287_p5 = pneg %p1286_p4  ;;  %p1293_p10 = por %p1292_p7, %p1291_p6 }
  0xac   : > { %681 = vst [vmem:[%s1731_s9 + $0x28] sm:$0xff] %v673_v36 }
  0xad   : > { %682 = vst [vmem:[%s1731_s9 + $0x30] sm:$0xff] %v674_v38  ;;  %v675_v34 = vmul.f32 %v659_v37, %v583_v40  ;;  %p1294_p13 = pnand %p1293_p10, %p1287_p5 }
  0xaf   : > { %683 = vst [vmem:[%s1731_s9 + $0x38] sm:$0xff] %v675_v34 }
  0xb0   : > { %1297 = shalt.err (!%p1294_p13)
}
  0xb1   : > { %s1298_s8 = scalar_lea.hbm %s704_s6, 1024  ;;  %s1302_s15 = scalar_lea.hbm %s1846_s13, 2048 }
  0xb2   : > { %p1299_p12 = scmp.ne.s32.totalorder %s704_s6, %s1298_s8  ;;  %p1303_p8 = scmp.lt.s32.totalorder %s704_s6, %s1846_s13 }
  0xb3   : > { %p1304_p0 = scmp.lt.s32.totalorder %s1302_s15, %s1298_s8 }
  0xb4   : > { %p1300_p1 = pnand %p1299_p12, %p1485_p9 }
  0xb5   : > { %p1305_p3 = por %p1304_p0, %p1303_p8 }
  0xb6   : > { %p1301_p2 = pneg %p1300_p1 }
  0xb8   : > { %p1306_p4 = pnand %p1305_p3, %p1301_p2 }
  0xba   : > { %1309 = shalt.err (!%p1306_p4)
}
  0xbb   : > { %1010 = dma.vmem_to_hbm [thread:$0]  (%p1485_p9), %s707_s23, 1024, %s704_s6, %s685_s3  }
  0xbc PF: > { %s1847_s10 = sld [smem:[#allocation23_spill]] }
  0xbd   : > { %s1849_s21 = sld [smem:[#allocation26_spill]] }
  0xc2   : > { %s732_s30 = sand.u32 1, %s1847_s10  }
  0xc3   : > { %p1850_p5 = scmp.ge.s32.totalorder %s1849_s21, 2  ;;  %s733_s28 = scalar_lea.sflag [#allocation5], %s732_s30 }
  0xc5   : > { %p1034_p6 = pnand %p1850_p5, %p1492_p11 }
  0xc7   : > { %p1035_p7 = pneg %p1034_p6 }
  0xc9   : > { %1351 = dma.done.wait (%p1035_p7), %s733_s28, 1024  }
  0xca   : > { %1353 = vsyncadd (%p1035_p7), %s733_s28, 4294966272  ;;  %s742_s9 = scalar_lea.sflag [#allocation16], %s732_s30 }
  0xcb   : > { %1355 = dma.done.wait (%p1035_p7), %s742_s9, 256  }
  0xcc   : > { %1357 = vsyncadd (%p1035_p7), %s742_s9, 4294967040  ;;  %s36_s29 = sadd.s32 1, %s1849_s21   ;;  %s1851_s18 = sld [smem:[#allocation24_spill]] }
  0xcd   : > { %p33_p10 = scmp.ge.s32.totalorder %s36_s29, 4   ;;  %s1852_s26 = sld [smem:[#allocation29_spill]] }
  0xce   : > { %s1853_s27 = sld [smem:[#allocation25_spill]]  ;;  %s1855_s24 = smov %s1364_s25 }
  0xcf   : > { %s1854_s28 = sld [smem:[#allocation27_spill]]  ;;  %35 = sbr.rel (!%p33_p10) target bundleno = 18 (0x12), region = 171 }
  0xd2   : > { %s1856_s25 = smov %s1851_s18 }
  0xd4   :  { %747 = vsyncpa [#allocation4], 1 }
  0xd5   :  { %749 = vsyncpa [#allocation4 + $0x1], 1 }
  0xd6   :  { %750 = vsyncpa [#allocation7], 1 }
  0xd7   :  { %752 = vsyncpa [#allocation7 + $0x1], 1 }
  0xd8   :  { %753 = vsyncpa [#allocation10], 1 }
  0xd9   :  { %755 = vsyncpa [#allocation10 + $0x1], 1 }
  0xda   :  { %756 = vsyncpa [#allocation13], 1 }
  0xdb   :  { %758 = vsyncpa [#allocation13 + $0x1], 1 }
  0xdc   :  { %759 = vsyncpa [#allocation5], 1 }
  0xdd   :  { %761 = vsyncpa [#allocation5 + $0x1], 1 }
  0xde   :  { %762 = vsyncpa [#allocation16], 1 }
  0xdf   :  { %764 = vsyncpa [#allocation16 + $0x1], 1 }

</bundles_post_ra>
